<compile_context>
chip_gen: v7x
topology: tpu7x:2x2x1
jax: 0.10.0
libtpu: 0.0.40
codegen_flags: <defaults>
</compile_context>

<pallas_src>
import jax
import jax.numpy as jnp
from jax import lax
from jax.experimental import pallas as pl
from jax.experimental.pallas import tpu as pltpu  # noqa: F401


# ---------------------------------------------------------------------------
# Fused kernel: history MLP + latent MLP + masked score matrix
# ---------------------------------------------------------------------------
def _critic_kernel(hist_ref, latent_ref, hw1_ref, lw1_ref,
                   w2_ref, b1_ref, b2_ref, out_ref):
    # ---- history encoder: single matmul on the pre-concatenated slab ----
    h_hid = jnp.maximum(
        jnp.dot(hist_ref[...], hw1_ref[...], preferred_element_type=jnp.float32)
        + b1_ref[0:1, :], 0.0)
    h_enc = (jnp.dot(h_hid, w2_ref[0], preferred_element_type=jnp.float32)
             + b2_ref[0:1, :])

    # ---- latent encoder ----
    l_hid = jnp.maximum(
        jnp.dot(latent_ref[...], lw1_ref[...], preferred_element_type=jnp.float32)
        + b1_ref[1:2, :], 0.0)
    l_enc = (jnp.dot(l_hid, w2_ref[1], preferred_element_type=jnp.float32)
             + b2_ref[1:2, :])

    # ---- score = h_enc @ l_enc.T (contract last dims, no explicit transpose) ----
    s = lax.dot_general(h_enc, l_enc,
                        dimension_numbers=(((1,), (1,)), ((), ())),
                        preferred_element_type=jnp.float32)

    # ---- diagonal / off-diagonal split: one select, one subtraction ----
    B = s.shape[0]
    on_diag = (lax.broadcasted_iota(jnp.int32, (B, B), 0)
               == lax.broadcasted_iota(jnp.int32, (B, B), 1))
    joint = jnp.where(on_diag, s, jnp.zeros_like(s))
    out_ref[0] = joint        # diagonal-only   (scores_joint)
    out_ref[1] = s - joint    # off-diag-only   (scores_prod)


def _full_spec(shape):
    # Single grid point, full-array VMEM blocks (everything here is tiny).
    return pl.BlockSpec(shape, lambda: tuple(0 for _ in shape))


# ---------------------------------------------------------------------------
# Module wrapper
# ---------------------------------------------------------------------------
class CriticDotProdPallas:
    """Separable critic: two 2-layer MLP encoders + masked dot-product score
    matrix, fused into a single Pallas TPU kernel."""

    def __init__(self, key, hist_in_dim, latent_dim, hidden=32, enc_dim=32):
        k1, k2, k3, k4 = jax.random.split(key, 4)
        s = 0.1
        # history encoder params
        self.hw1 = s * jax.random.normal(k1, (hist_in_dim, hidden), jnp.float32)
        self.hb1 = jnp.zeros((1, hidden), jnp.float32)
        self.hw2 = s * jax.random.normal(k2, (hidden, enc_dim), jnp.float32)
        self.hb2 = jnp.zeros((1, enc_dim), jnp.float32)
        # latent encoder params
        self.lw1 = s * jax.random.normal(k3, (latent_dim, hidden), jnp.float32)
        self.lb1 = jnp.zeros((1, hidden), jnp.float32)
        self.lw2 = s * jax.random.normal(k4, (hidden, enc_dim), jnp.float32)
        self.lb2 = jnp.zeros((1, enc_dim), jnp.float32)
        # Packed parameter slabs: fewer kernel inputs => fewer DMA descriptors.
        self.w2_stack = jnp.stack([self.hw2, self.lw2])              # (2, H, E)
        self.b1_stack = jnp.concatenate([self.hb1, self.lb1], 0)     # (2, H)
        self.b2_stack = jnp.concatenate([self.hb2, self.lb2], 0)     # (2, E)

    def __call__(self, latent, *design_obs_tensors):
        B = latent.shape[0]
        # One wrapper-side concat (fuses into the input DMA); the kernel then
        # performs a single history matmul instead of n_chunks tiny K=4 ones.
        hist_in = jnp.concatenate(
            [jnp.reshape(t, (t.shape[0], -1)) for t in design_obs_tensors],
            axis=-1)
        assert hist_in.shape[1] == self.hw1.shape[0]

        inputs = (hist_in, latent, self.hw1, self.lw1,
                  self.w2_stack, self.b1_stack, self.b2_stack)

        out = pl.pallas_call(
            _critic_kernel,
            out_shape=jax.ShapeDtypeStruct((2, B, B), jnp.float32),
            grid=(),
            in_specs=[_full_spec(x.shape) for x in inputs],
            out_specs=_full_spec((2, B, B)),
        )(*inputs)
        # Split the merged output in the wrapper (free static slices).
        return out[0], out[1]


# ---------------------------------------------------------------------------
# Pure-JAX reference (for correctness check)
# ---------------------------------------------------------------------------
def reference(critic, latent, *design_obs_tensors):
    hist_in = jnp.concatenate([jnp.reshape(t, (t.shape[0], -1))
                               for t in design_obs_tensors], axis=-1)
    h = jnp.maximum(hist_in @ critic.hw1 + critic.hb1, 0.0) @ critic.hw2 + critic.hb2
    l = jnp.maximum(latent @ critic.lw1 + critic.lb1, 0.0) @ critic.lw2 + critic.lb2
    s = h @ l.T
    eye = jnp.eye(h.shape[0], dtype=s.dtype)
    return s * eye, s * (1.0 - eye)


if __name__ == "__main__":
    key = jax.random.PRNGKey(0)
    kp, kl, kd1, ko1, kd2, ko2 = jax.random.split(key, 6)

    B, latent_dim, design_dim, obs_dim = 8, 16, 4, 4
    latent = jax.random.normal(kl, (B, latent_dim), jnp.float32)
    design1 = jax.random.normal(kd1, (B, design_dim), jnp.float32)
    obs1 = jax.random.normal(ko1, (B, obs_dim), jnp.float32)
    design2 = jax.random.normal(kd2, (B, design_dim), jnp.float32)
    obs2 = jax.random.normal(ko2, (B, obs_dim), jnp.float32)

    hist_in_dim = 2 * (design_dim + obs_dim)
    critic = CriticDotProdPallas(kp, hist_in_dim, latent_dim,
                                 hidden=32, enc_dim=32)

    scores_joint, scores_prod = critic(latent, design1, obs1, design2, obs2)
    jax.block_until_ready(scores_joint)
    jax.block_until_ready(scores_prod)

    ref_joint, ref_prod = reference(critic, latent, design1, obs1, design2, obs2)
    assert scores_joint.shape == (B, B) and scores_prod.shape == (B, B)
    assert jnp.allclose(scores_joint, ref_joint, atol=1e-5, rtol=1e-5)
    assert jnp.allclose(scores_prod, ref_prod, atol=1e-5, rtol=1e-5)
    # diagonal-only / off-diagonal-only structure
    assert jnp.allclose(scores_prod * jnp.eye(B), 0.0)
    assert jnp.allclose(scores_joint * (1.0 - jnp.eye(B)), 0.0)

    print("KERNEL_OK")
</pallas_src>

<mosaic_0001>
module attributes {stable_mosaic.version = 11 : i64} {
  func.func @_critic_kernel(%arg0: memref<8x16xf32, #tpu.memory_space<vmem>>, %arg1: memref<8x16xf32, #tpu.memory_space<vmem>>, %arg2: memref<16x32xf32, #tpu.memory_space<vmem>>, %arg3: memref<16x32xf32, #tpu.memory_space<vmem>>, %arg4: memref<2x32x32xf32, #tpu.memory_space<vmem>>, %arg5: memref<2x32xf32, #tpu.memory_space<vmem>>, %arg6: memref<2x32xf32, #tpu.memory_space<vmem>>, %arg7: memref<2x8x8xf32, #tpu.memory_space<vmem>>) attributes {dimension_semantics = [], scalar_prefetch = 0 : i64, scratch_operands = 0 : i64, tpu.core_type = #tpu.core_type<tc>} {
    %c0 = arith.constant 0 : index
    %c0_0 = arith.constant 0 : index
    %0 = vector.load %arg0[%c0, %c0_0] : memref<8x16xf32, #tpu.memory_space<vmem>>, vector<8x16xf32>
    %c0_1 = arith.constant 0 : index
    %c0_2 = arith.constant 0 : index
    %1 = vector.load %arg2[%c0_1, %c0_2] : memref<16x32xf32, #tpu.memory_space<vmem>>, vector<16x32xf32>
    %cst = arith.constant dense<0.000000e+00> : vector<8x32xf32>
    %2 = tpu.matmul %0, %1, %cst {dimension_numbers = #tpu.dot_dimension_numbers<[1], [0], [0], [1], [0, 0, 1, 1], [], []>} : vector<8x16xf32>, vector<16x32xf32>, vector<8x32xf32> -> vector<8x32xf32>
    %c0_3 = arith.constant 0 : index
    %c0_4 = arith.constant 0 : index
    %3 = vector.load %arg5[%c0_3, %c0_4] : memref<2x32xf32, #tpu.memory_space<vmem>>, vector<1x32xf32>
    %4 = vector.broadcast %3 : vector<1x32xf32> to vector<8x32xf32>
    %5 = arith.addf %2, %4 : vector<8x32xf32>
    %cst_5 = arith.constant 0.000000e+00 : f32
    %6 = vector.broadcast %cst_5 : f32 to vector<8x32xf32>
    %7 = arith.maximumf %5, %6 : vector<8x32xf32>
    %c0_6 = arith.constant 0 : index
    %c0_7 = arith.constant 0 : index
    %c0_8 = arith.constant 0 : index
    %8 = vector.load %arg4[%c0_6, %c0_7, %c0_8] : memref<2x32x32xf32, #tpu.memory_space<vmem>>, vector<1x32x32xf32>
    %9 = vector.shape_cast %8 : vector<1x32x32xf32> to vector<32x32xf32>
    %cst_9 = arith.constant dense<0.000000e+00> : vector<8x32xf32>
    %10 = tpu.matmul %7, %9, %cst_9 {dimension_numbers = #tpu.dot_dimension_numbers<[1], [0], [0], [1], [0, 0, 1, 1], [], []>} : vector<8x32xf32>, vector<32x32xf32>, vector<8x32xf32> -> vector<8x32xf32>
    %c0_10 = arith.constant 0 : index
    %c0_11 = arith.constant 0 : index
    %11 = vector.load %arg6[%c0_10, %c0_11] : memref<2x32xf32, #tpu.memory_space<vmem>>, vector<1x32xf32>
    %12 = vector.broadcast %11 : vector<1x32xf32> to vector<8x32xf32>
    %13 = arith.addf %10, %12 : vector<8x32xf32>
    %c0_12 = arith.constant 0 : index
    %c0_13 = arith.constant 0 : index
    %14 = vector.load %arg1[%c0_12, %c0_13] : memref<8x16xf32, #tpu.memory_space<vmem>>, vector<8x16xf32>
    %c0_14 = arith.constant 0 : index
    %c0_15 = arith.constant 0 : index
    %15 = vector.load %arg3[%c0_14, %c0_15] : memref<16x32xf32, #tpu.memory_space<vmem>>, vector<16x32xf32>
    %cst_16 = arith.constant dense<0.000000e+00> : vector<8x32xf32>
    %16 = tpu.matmul %14, %15, %cst_16 {dimension_numbers = #tpu.dot_dimension_numbers<[1], [0], [0], [1], [0, 0, 1, 1], [], []>} : vector<8x16xf32>, vector<16x32xf32>, vector<8x32xf32> -> vector<8x32xf32>
    %c1 = arith.constant 1 : index
    %c0_17 = arith.constant 0 : index
    %17 = vector.load %arg5[%c1, %c0_17] : memref<2x32xf32, #tpu.memory_space<vmem>>, vector<1x32xf32>
    %18 = vector.broadcast %17 : vector<1x32xf32> to vector<8x32xf32>
    %19 = arith.addf %16, %18 : vector<8x32xf32>
    %cst_18 = arith.constant 0.000000e+00 : f32
    %20 = vector.broadcast %cst_18 : f32 to vector<8x32xf32>
    %21 = arith.maximumf %19, %20 : vector<8x32xf32>
    %c1_19 = arith.constant 1 : index
    %c0_20 = arith.constant 0 : index
    %c0_21 = arith.constant 0 : index
    %22 = vector.load %arg4[%c1_19, %c0_20, %c0_21] : memref<2x32x32xf32, #tpu.memory_space<vmem>>, vector<1x32x32xf32>
    %23 = vector.shape_cast %22 : vector<1x32x32xf32> to vector<32x32xf32>
    %cst_22 = arith.constant dense<0.000000e+00> : vector<8x32xf32>
    %24 = tpu.matmul %21, %23, %cst_22 {dimension_numbers = #tpu.dot_dimension_numbers<[1], [0], [0], [1], [0, 0, 1, 1], [], []>} : vector<8x32xf32>, vector<32x32xf32>, vector<8x32xf32> -> vector<8x32xf32>
    %c1_23 = arith.constant 1 : index
    %c0_24 = arith.constant 0 : index
    %25 = vector.load %arg6[%c1_23, %c0_24] : memref<2x32xf32, #tpu.memory_space<vmem>>, vector<1x32xf32>
    %26 = vector.broadcast %25 : vector<1x32xf32> to vector<8x32xf32>
    %27 = arith.addf %24, %26 : vector<8x32xf32>
    %cst_25 = arith.constant dense<0.000000e+00> : vector<8x8xf32>
    %28 = tpu.matmul %13, %27, %cst_25 {dimension_numbers = #tpu.dot_dimension_numbers<[1], [1], [0], [0], [0, 0, 1, 0], [], []>} : vector<8x32xf32>, vector<8x32xf32>, vector<8x8xf32> -> vector<8x8xf32>
    %29 = tpu.iota {dimensions = array<i32: 0>} : vector<8x8xi32>
    %30 = tpu.iota {dimensions = array<i32: 1>} : vector<8x8xi32>
    %31 = arith.cmpi eq, %29, %30 : vector<8x8xi32>
    %cst_26 = arith.constant 0.000000e+00 : f32
    %32 = vector.broadcast %cst_26 : f32 to vector<8x8xf32>
    %33 = arith.select %31, %28, %32 : vector<8x8xi1>, vector<8x8xf32>
    %c0_27 = arith.constant 0 : index
    %c0_28 = arith.constant 0 : index
    %c0_29 = arith.constant 0 : index
    %34 = vector.load %arg7[%c0_27, %c0_28, %c0_29] : memref<2x8x8xf32, #tpu.memory_space<vmem>>, vector<1x8x8xf32>
    %35 = vector.shape_cast %34 : vector<1x8x8xf32> to vector<8x8xf32>
    %36 = vector.shape_cast %33 : vector<8x8xf32> to vector<1x8x8xf32>
    tpu.vector_store %arg7[%c0_27, %c0_28, %c0_29], %36 {strides = array<i32>} : memref<2x8x8xf32, #tpu.memory_space<vmem>>, vector<1x8x8xf32>,
    %37 = arith.subf %28, %33 : vector<8x8xf32>
    %c1_30 = arith.constant 1 : index
    %c0_31 = arith.constant 0 : index
    %c0_32 = arith.constant 0 : index
    %38 = vector.load %arg7[%c1_30, %c0_31, %c0_32] : memref<2x8x8xf32, #tpu.memory_space<vmem>>, vector<1x8x8xf32>
    %39 = vector.shape_cast %38 : vector<1x8x8xf32> to vector<8x8xf32>
    %40 = vector.shape_cast %37 : vector<8x8xf32> to vector<1x8x8xf32>
    tpu.vector_store %arg7[%c1_30, %c0_31, %c0_32], %40 {strides = array<i32>} : memref<2x8x8xf32, #tpu.memory_space<vmem>>, vector<1x8x8xf32>,
    return
  }
}

</mosaic_0001>

<bundles_post_ra>
// kernel: tpu_custom_call.1
= control target key start
LH: loop header
LB: loop body
LE: loop exit
PB: predicated region body
PF: predicated region fallthrough
CT: control target
= control target key end

     0   :  { %12 = vsyncpa [#allocation3], 0  ;;  %s922_s0 = inlined_call_operand.hbm [shape: f32[8,16], index: 0, kind: input, shape index: {}]   ;;  %s923_s1 = inlined_call_operand.hbm [shape: f32[8,16], index: 1, kind: input, shape index: {}]   ;;  %s924_s2 = inlined_call_operand.hbm [shape: f32[16,32], index: 2, kind: input, shape index: {}]   ;;  %s925_s3 = inlined_call_operand.hbm [shape: f32[16,32], index: 3, kind: input, shape index: {}]   ;;  %s926_s4 = inlined_call_operand.hbm [shape: f32[2,32,32], index: 4, kind: input, shape index: {}]   ;;  %s927_s5 = inlined_call_operand.vmem [shape: f32[2,32], index: 5, kind: input, shape index: {}]   ;;  %s928_s6 = inlined_call_operand.vmem [shape: f32[2,32], index: 6, kind: input, shape index: {}]   ;;  %s929_s7 = inlined_call_operand.hbm [shape: f32[2,8,8], index: 7, kind: output, shape index: {}]  }
   0x1   :  { %13 = vsyncpa [#allocation6], 0 }
   0x2   :  { %14 = vsyncpa [#allocation9], 0 }
   0x3   :  { %15 = vsyncpa [#allocation4], 0  ;;  %s766_s24 = smov [#allocation5]   ;;  %s626_s28 = scalar_lea.hbm %s923_s1, 128 }
   0x4   :  { %s32_s25 = sshll.u32 %s766_s24, 4  ;;  %p627_p0 = scmp.ne.s32.totalorder %s923_s1, %s626_s28  ;;  %s33_s25 = int_to_ptr.vmem [resolvable:$true] %s32_s25 }
   0x5   :  { %p630_p1 = scmp.lt.u32.totalorder %s626_s28, %s923_s1 }
   0x7   :  { %p632_p2 = pnand %p630_p1, %p627_p0 }
   0x9   :  { %635 = shalt.err (!%p632_p2)
}
   0xa   :  { %s636_s10 = scalar_lea.vmem %s33_s25, 128  ;;  %p641_p4 = scmp.lt.s32.totalorder %s33_s25, %s33_s25 }
   0xb   :  { %p637_p3 = scmp.ne.s32.totalorder %s33_s25, %s636_s10  ;;  %p642_p5 = scmp.lt.s32.totalorder %s636_s10, %s636_s10 }
   0xd   :  { %p643_p6 = por %p642_p5, %p641_p4 }
   0xf   :  { %p644_p7 = pnand %p643_p6, %p637_p3 }
  0x11   :  { %647 = shalt.err (!%p644_p7)
}
  0x12   :  { %35 = dma.hbm_to_vmem [thread:$0]  %s923_s1, 128, %s33_s25, [#allocation6]  }
  0x13   :  { %s767_s13 = smov [#allocation8]   ;;  %s768_s15 = smov [#allocation2]  }
  0x14   :  { %s53_s14 = sshll.u32 %s767_s13, 4  ;;  %s22_s16 = sshll.u32 %s768_s15, 4  ;;  %s54_s14 = int_to_ptr.vmem [resolvable:$true] %s53_s14  ;;  %s23_s16 = int_to_ptr.vmem [resolvable:$true] %s22_s16 }
  0x15   :  { %s648_s19 = scalar_lea.hbm %s925_s3, 256 }
  0x16   :  { %p649_p8 = scmp.ne.s32.totalorder %s925_s3, %s648_s19  ;;  %p652_p9 = scmp.lt.u32.totalorder %s648_s19, %s925_s3 }
  0x18   :  { %p654_p10 = pnand %p652_p9, %p649_p8 }
  0x1a   :  { %657 = shalt.err (!%p654_p10)
}
  0x1b   :  { %s658_s1 = scalar_lea.vmem %s54_s14, 256  ;;  %p663_p12 = scmp.lt.s32.totalorder %s54_s14, %s54_s14 }
  0x1c   :  { %p659_p11 = scmp.ne.s32.totalorder %s54_s14, %s658_s1  ;;  %p664_p13 = scmp.lt.s32.totalorder %s658_s1, %s658_s1 }
  0x1e   :  { %p665_p0 = por %p664_p13, %p663_p12 }
  0x20   :  { %p666_p1 = pnand %p665_p0, %p659_p11 }
  0x22   :  { %669 = shalt.err (!%p666_p1)
}
  0x23   :  { %s769_s24 = smov 128   ;;  %s770_s25 = smov 8  }
  0x24   :  { %59 = dma.hbm_to_vmem [thread:$0]  %s925_s3, 256, %s54_s14, [#allocation9], %s769_s24, %s769_s24, %s770_s25  }
  0x25   :  { %s670_s30 = scalar_lea.hbm %s922_s0, 128 }
  0x26   :  { %p671_p2 = scmp.ne.s32.totalorder %s922_s0, %s670_s30  ;;  %p674_p3 = scmp.lt.u32.totalorder %s670_s30, %s922_s0 }
  0x28   :  { %p676_p4 = pnand %p674_p3, %p671_p2 }
  0x2a   :  { %679 = shalt.err (!%p676_p4)
}
  0x2b   :  { %s680_s12 = scalar_lea.vmem %s23_s16, 128  ;;  %p685_p6 = scmp.lt.s32.totalorder %s23_s16, %s23_s16 }
  0x2c   :  { %p681_p5 = scmp.ne.s32.totalorder %s23_s16, %s680_s12  ;;  %p686_p7 = scmp.lt.s32.totalorder %s680_s12, %s680_s12 }
  0x2e   :  { %p687_p8 = por %p686_p7, %p685_p6 }
  0x30   :  { %p688_p9 = pnand %p687_p8, %p681_p5 }
  0x32   :  { %691 = shalt.err (!%p688_p9)
}
  0x33   :  { %25 = dma.hbm_to_vmem [thread:$0]  %s922_s0, 128, %s23_s16, [#allocation3]  }
  0x34   :  { %s771_s14 = smov [#allocation7]   ;;  %s772_s17 = smov [#allocation10]  }
  0x35   :  { %s41_s15 = sshll.u32 %s771_s14, 4  ;;  %s65_s18 = sshll.u32 %s772_s17, 4  ;;  %s42_s15 = int_to_ptr.vmem [resolvable:$true] %s41_s15  ;;  %s66_s18 = int_to_ptr.vmem [resolvable:$true] %s65_s18 }
  0x36   :  { %s692_s21 = scalar_lea.hbm %s924_s2, 256 }
  0x37   :  { %p693_p10 = scmp.ne.s32.totalorder %s924_s2, %s692_s21  ;;  %p696_p11 = scmp.lt.u32.totalorder %s692_s21, %s924_s2 }
  0x39   :  { %p698_p12 = pnand %p696_p11, %p693_p10 }
  0x3b   :  { %701 = shalt.err (!%p698_p12)
}
  0x3c   :  { %s702_s0 = scalar_lea.vmem %s42_s15, 256  ;;  %p707_p0 = scmp.lt.s32.totalorder %s42_s15, %s42_s15 }
  0x3d   :  { %p703_p13 = scmp.ne.s32.totalorder %s42_s15, %s702_s0  ;;  %p708_p1 = scmp.lt.s32.totalorder %s702_s0, %s702_s0 }
  0x3f   :  { %p709_p2 = por %p708_p1, %p707_p0 }
  0x41   :  { %p710_p3 = pnand %p709_p2, %p703_p13 }
  0x43   :  { %713 = shalt.err (!%p710_p3)
}
  0x44   :  { %47 = dma.hbm_to_vmem [thread:$0]  %s924_s2, 256, %s42_s15, [#allocation6], %s769_s24, %s769_s24, %s770_s25  }
  0x45   :  { %s714_s30 = scalar_lea.hbm %s926_s4, 1024 }
  0x46   :  { %p715_p4 = scmp.ne.s32.totalorder %s926_s4, %s714_s30  ;;  %p718_p5 = scmp.lt.u32.totalorder %s714_s30, %s926_s4 }
  0x48   :  { %p720_p6 = pnand %p718_p5, %p715_p4 }
  0x4a   :  { %723 = shalt.err (!%p720_p6)
}
  0x4b   :  { %s724_s12 = scalar_lea.vmem %s66_s18, 1024  ;;  %p729_p8 = scmp.lt.s32.totalorder %s66_s18, %s66_s18 }
  0x4c   :  { %p725_p7 = scmp.ne.s32.totalorder %s66_s18, %s724_s12  ;;  %p730_p9 = scmp.lt.s32.totalorder %s724_s12, %s724_s12 }
  0x4e   :  { %p731_p10 = por %p730_p9, %p729_p8 }
  0x50   :  { %p732_p11 = pnand %p731_p10, %p725_p7 }
  0x52   :  { %735 = shalt.err (!%p732_p11)
}
  0x53   :  { %71 = dma.hbm_to_vmem [thread:$0]  %s926_s4, 1024, %s66_s18, [#allocation9], %s769_s24, %s769_s24, %s770_s25  }
  0x54   :  { %758 = dma.done.wait [#allocation3], 128  }
  0x55   :  { %759 = vsyncadd [#allocation3], 4294967168 }
  0x56   :  { %760 = dma.done.wait [#allocation6], 384  }
  0x57   :  { %761 = vsyncadd [#allocation6], 4294966912 }
  0x58   :  { %762 = dma.done.wait [#allocation9], 1280  }
  0x59   :  { %763 = vsyncadd [#allocation9], 4294966016  ;;  %v773_v0 = vmov 0.0|0.0   ;;  %vm774_vm0 = vmmov 0   ;;  %v775_v1 = vmov 0.0   ;;  %v92_v2 = vld [vmem:[#allocation7] sm:$0xff]  ;;  %v498_v40 = vlaneseq }
  0x5a   :  { %597 = vmatprep.subr.bf16.mxu0 %v773_v0  ;;  %560 = vmatprep.mubr.msk.f32.mxu0 %vm774_vm0, %v775_v1  ;;  %v93_v3 = vld [vmem:[#allocation7 + $0x8] sm:$0xff]  ;;  %v258_v5 = vld [vmem:[#allocation8] sm:$0xff]  ;;  %v259_v6 = vld [vmem:[#allocation8 + $0x8] sm:$0xff]  ;;  %vm99_vm1 = vcmask 130048   ;;  %vm183_vm2 = vcmask 261120   ;;  %vm504_vm4 = vcmask 64512  }
  0x5b   :  { %600 = vmatprep.subr.bf16.mxu1 %v773_v0  ;;  %571 = vmatprep.mubr.msk.f32.mxu1 %vm774_vm0, %v775_v1  ;;  %v598_v4 = vpack.c.bf16 %v93_v3, %v92_v2  ;;  %v174_v7 = vld [vmem:[#allocation10] sm:$0xff]  ;;  %v175_v8 = vld [vmem:[#allocation10 + $0x8] sm:$0xff]  ;;  %v91_v9 = vld [vmem:[#allocation2] sm:$0xff]  ;;  %v607_v10 = vpack.c.bf16 %v259_v6, %v258_v5  ;;  %v499_v41 = vshrl.u32 %v498_v40, 7  ;;  %v501_v42 = vand.u32 127, %v498_v40  ;;  %s776_s20 = smov [#allocation11]  }
  0x5c   :  { %v601_v11 = vpack.c.bf16 %v175_v8, %v174_v7  ;;  %v257_v12 = vld [vmem:[#allocation5] sm:$0xff]  ;;  %v176_v13 = vld [vmem:[#allocation10 + $0x10] sm:$0xff]  ;;  %v340_v15 = vld [vmem:[#allocation10 + $0x20] sm:$0xff]  ;;  %s514_s21 = sshll.u32 %s776_s20, 4  ;;  %s515_s21 = int_to_ptr.vmem [resolvable:$true] %s514_s21 }
  0x5d   :  { %599 = vmatpush3.bf16.msra.mxu0 %v598_v4  ;;  %v177_v14 = vld [vmem:[#allocation10 + $0x18] sm:$0xff]  ;;  %v341_v17 = vld [vmem:[#allocation10 + $0x28] sm:$0xff]  ;;  %v342_v19 = vld [vmem:[#allocation10 + $0x30] sm:$0xff]  ;;  %vm502_vm3 = vcmp.eq.s32.totalorder %v499_v41, %v501_v42  ;;  %p741_p13 = scmp.lt.s32.totalorder %s515_s21, %s515_s21 }
  0x5e   :  { %606 = vmatprep.subr.bf16.mxu0 %v773_v0  ;;  %602 = vmatpush3.bf16.msra.mxu1 %v601_v11  ;;  %v604_v16 = vpack.c.bf16 %v177_v14, %v176_v13  ;;  %v610_v18 = vpack.c.bf16 %v341_v17, %v340_v15  ;;  %v343_v20 = vld [vmem:[#allocation10 + $0x38] sm:$0xff]  ;;  %v528_v22 = vld [vmem:[%s927_s5] ss:$0 sm:$0xff]  ;;  %v532_v26 = vld [vmem:[%s927_s5 + $0x1] ss:$0 sm:$0xff] }
  0x5f   :  { %603 = vmatprep.subr.bf16.mxu1 %v773_v0  ;;  %v613_v21 = vpack.c.bf16 %v343_v20, %v342_v19  ;;  %v534_v34 = vld [vmem:[%s928_s6 + $0x1] ss:$0 sm:$0xff]  ;;  %v530_v36 = vld [vmem:[%s928_s6] ss:$0 sm:$0xff]  ;;  %s736_s6 = scalar_lea.vmem %s515_s21, 256 }
  0x60   :  { %561 = vmatmul.mubr.msk.f32.vlgmr.msra.gmra.mrb[0].mxu0 %vm99_vm1, %v91_v9  ;;  %p737_p12 = scmp.ne.s32.totalorder %s515_s21, %s736_s6  ;;  %p742_p0 = scmp.lt.s32.totalorder %s736_s6, %s736_s6 }
  0x61   :  { %608 = vmatpush3.bf16.msra.mxu0 %v607_v10  ;;  %578 = vmatprep.mubr.msk.f32.mxu0 %vm774_vm0, %v775_v1 }
  0x62   :  { %609 = vmatprep.subr.bf16.mxu0 %v773_v0  ;;  %605 = vmatpush3.bf16.msra.mxu1 %v604_v16  ;;  %p743_p1 = por %p742_p0, %p741_p13 }
  0x63   :  { %592 = vmatprep.subr.mxu1 %v775_v1 }
  0x64   :  { %579 = vmatmul.mubr.msk.f32.vlgmr.msra.gmra.mrb[2].mxu0 %vm99_vm1, %v257_v12  ;;  %p744_p2 = pnand %p743_p1, %p737_p12 }
  0x65   :  { %589 = vmatprep.mubr.msk.f32.mxu0 %vm774_vm0, %v775_v1  ;;  %611 = vmatpush3.bf16.msra.mxu0 %v610_v18 }
  0x66   :  { %612 = vmatprep.subr.bf16.mxu0 %v773_v0 }
  0x69   :  { %614 = vmatpush3.bf16.msra.mxu0 %v613_v21 }
 0x133   :  { %v169_v23 = vpop.f32.mrb[0].mxu0 }
 0x134   :  { %v170_v24 = vadd.f32 %v528_v22, %v169_v23  ;;  %v562_v25 = vpop.f32.mrb[1].mxu0 }
 0x136   :  { %v173_v27 = vmax.f32 %v170_v24, 0.0 }
 0x137   :  { %v334_v28 = vpop.f32.mrb[2].mxu0 }
 0x138   :  { %v335_v29 = vadd.f32 %v532_v26, %v334_v28  ;;  %572 = vmatmul.mubr.msk.f32.vlgmr.msra.gmra.mrb[0].mxu1 %vm183_vm2, %v173_v27  ;;  %v580_v30 = vpop.f32.mrb[3].mxu0 }
 0x139   :  { %594 = vmatprep.mubr.msk.f32.mxu1 %vm774_vm0, %v775_v1 }
 0x13a   :  { %v338_v31 = vmax.f32 %v335_v29, 0.0 }
 0x13c   :  { %590 = vmatmul.mubr.msk.f32.vlgmr.msra.gmra.mrb[4].mxu0 %vm183_vm2, %v338_v31 }
 0x20b   :  { %v253_v32 = vpop.f32.mrb[0].mxu1 }
 0x20c   :  { %v573_v33 = vpop.f32.mrb[1].mxu1  ;;  %v254_v39 = vadd.f32 %v530_v36, %v253_v32 }
 0x20f   :  { %v418_v35 = vpop.f32.mrb[4].mxu0 }
 0x210   :  { %v419_v37 = vadd.f32 %v534_v34, %v418_v35  ;;  %v591_v38 = vpop.f32.mrb[5].mxu0 }
 0x212   :  { %593 = vmatpush3.xpose.msk.msra.mxu1 %vm183_vm2, %v419_v37 }
 0x215   :  { %595 = vmatmul.mubr.msk.f32.vlgmr.msra.gmra.mrb[2].mxu1 %vm183_vm2, %v254_v39 }
 0x2e8   :  { %v494_v43 = vpop.f32.mrb[2].mxu1 }
 0x2e9   :  { %v503_v44 = vsel %vm502_vm3, %v494_v43, 0.0  ;;  %v596_v45 = vpop.f32.mrb[3].mxu1 }
 0x2ea   :  { %v506_v46 = vsub.f32 %v494_v43, %v503_v44  ;;  %505 = vst.msk [vmem:[#allocation11] sm:$0xff] %vm504_vm4, %v503_v44 }
 0x2ec   :  { %508 = vst.msk [vmem:[#allocation11 + $0x8] sm:$0xff] %vm504_vm4, %v506_v46 }
 0x2ed   :  { %747 = shalt.err (!%p744_p2)
}
 0x2ee   :  { %s748_s1 = scalar_lea.hbm %s929_s7, 256 }
 0x2ef   :  { %p749_p3 = scmp.ne.s32.totalorder %s929_s7, %s748_s1  ;;  %p752_p4 = scmp.lt.u32.totalorder %s748_s1, %s929_s7 }
 0x2f1   :  { %p754_p5 = pnand %p752_p4, %p749_p3 }
 0x2f3   :  { %757 = shalt.err (!%p754_p5)
}
 0x2f4   :  { %520 = dma.vmem_to_hbm [thread:$0]  %s515_s21, 256, %s929_s7, [#allocation4], %s769_s24, %s769_s24, %s770_s25  }
 0x2f5   :  { %764 = dma.done.wait [#allocation4], 256  }
 0x2f6   :  { %765 = vsyncadd [#allocation4], 4294967040 }
 0x2f7   :  { %524 = vsyncpa [#allocation3], 1 }
 0x2f8   :  { %525 = vsyncpa [#allocation6], 1 }
 0x2f9   :  { %526 = vsyncpa [#allocation9], 1 }
 0x2fa   :  { %527 = vsyncpa [#allocation4], 1 }

</bundles_post_ra>
